<compile_context>
chip_gen: v6e
topology: v6e:2x2x1
jax: 0.10.0
libtpu: 0.0.40
codegen_flags: <defaults>
</compile_context>

<pallas_src>
import functools

import jax
import jax.numpy as jnp
import numpy as np
from jax import lax
from jax.experimental import pallas as pl
from jax.experimental.pallas import tpu as pltpu

KSIZE = 9
PAD = 4


def convblock_kernel(x_ref, lh_ref, rh_ref, w1_ref, w2_ref,
                     s1_ref, b1_ref, s2_ref, b2_ref, o_ref):
    """One (batch, L-tile) block per grid step, channels-first / lane-dense.

    x_ref:  (1, Cin, Lt)       current tile (also the residual source), f32
    lh_ref: (1, Cin, Hw)       columns just left of this tile (clamped), f32
    rh_ref: (1, Cin, Hw)       columns just right of this tile (clamped), f32
    w1_ref: (Chid, KSIZE*Cin)  conv1 weights, column = tap*Cin + in_channel, bf16
    w2_ref: (Cout, Chid)       1x1 conv weights, bf16
    s1/b1:  (Chid, 1)          folded BN1 scale / shift, f32
    s2/b2:  (Cout, 1)          folded BN2 scale / shift, f32
    o_ref:  (1, Cout, Lt)      f32
    """
    lt = x_ref.shape[2]
    hw = lh_ref.shape[2]
    li = pl.program_id(1)
    n_l = pl.num_programs(1)

    x = x_ref[0]                                            # (Cin, Lt) f32

    # Halo columns; zero them at the sequence boundaries (Conv1d zero padding).
    lh = lh_ref[0][:, hw - PAD:]                            # (Cin, PAD)
    rh = rh_ref[0][:, :PAD]                                 # (Cin, PAD)
    lh = jnp.where(li > 0, lh, jnp.zeros_like(lh))
    rh = jnp.where(li < n_l - 1, rh, jnp.zeros_like(rh))

    xh = jnp.concatenate([lh, x, rh], axis=1).astype(jnp.bfloat16)  # (Cin, Lt+8)

    # im2col along sublanes: (KSIZE*Cin, Lt) patch matrix -> one deep MXU
    # contraction whose (Chid, Lt) output is lane-dense.
    # TODO(synk): for Cin >= 128 replace the materialised patch matrix with 9
    # accumulated per-tap dots (K = Cin each) to avoid the extra VMEM copy.
    patches = jnp.concatenate([xh[:, t:t + lt] for t in range(KSIZE)], axis=0)
    h = jnp.dot(w1_ref[...], patches,
                preferred_element_type=jnp.float32)         # (Chid, Lt)

    # BN1 (folded, inference) + SiLU in f32.
    h = h * s1_ref[...] + b1_ref[...]
    h = h * jax.nn.sigmoid(h)

    # 1x1 conv == channel matmul (lane-dense output), then BN2 (folded).
    o = jnp.dot(w2_ref[...], h.astype(jnp.bfloat16),
                preferred_element_type=jnp.float32)         # (Cout, Lt)
    o = o * s2_ref[...] + b2_ref[...]

    # Residual add in f32 (same input tile), lane-dense store.
    o_ref[0] = x + o


def _vmem_capacity_bytes():
    """Per-generation VMEM capacity (v7x: 64 MiB/TC, v5e/v6e: 128 MiB)."""
    try:
        return int(pltpu.get_tpu_info().vmem_capacity_bytes)
    except Exception:
        return 64 * 1024 * 1024  # conservative fallback (v7x per-TC VMEM)


def _pick_l_tile(L, cin, chid, cout, vmem_budget):
    """Largest L tile (multiple of 128, dividing L) fitting the VMEM budget."""
    if L % 128 != 0:
        return L                              # single full-width tile (small L)
    # bytes per L column: double-buffered pipelined blocks + in-kernel temps.
    per_col = (2 * cin * 4 + 2 * cout * 4          # x / out blocks (f32, 2 bufs)
               + cin * 2 + KSIZE * cin * 2         # xh + patch matrix (bf16)
               + 2 * chid * 4 + 2 * cout * 4)      # h / o f32 temporaries
    fixed = (2 * 2 * 2 * cin * 128 * 4                         # halo blocks
             + 2 * 2 * (KSIZE * cin * chid + chid * cout)      # bf16 weights
             + 2 * 4 * 2 * (chid + cout))                      # folded BN params
    lt = max(128, ((max(vmem_budget - fixed, 0) // per_col) // 128) * 128)
    lt = min(lt, L)
    while L % lt != 0:                        # largest multiple of 128 dividing L
        lt -= 128
    return lt


@functools.partial(jax.jit, static_argnames=("l_tile", "vmem_limit"))
def convblock_pallas(x_ncl, w1t, w2t, s1, b1, s2, b2, *, l_tile, vmem_limit):
    """x_ncl: (N, Cin, L) f32 (PyTorch layout).  w1t: (Chid, K*Cin) bf16.
    w2t: (Cout, Chid) bf16.  s*/b*: (C, 1) f32 folded BN.  -> (N, Cout, L) f32."""
    N, cin, L = x_ncl.shape
    chid = w1t.shape[0]
    cout = w2t.shape[0]
    assert cin == cout, "residual add requires inp == oup"
    assert l_tile == L or (l_tile % 128 == 0 and L % l_tile == 0)
    assert l_tile >= 2 * PAD
    nlt = L // l_tile
    halo_w = 128 if l_tile % 128 == 0 else l_tile
    lb = l_tile // halo_w                 # halo-width blocks per L tile
    last_blk = L // halo_w - 1

    cost = pl.CostEstimate(
        flops=2 * N * L * (KSIZE * cin * chid + chid * cout),
        transcendentals=N * L * chid,
        bytes_accessed=(4 * N * L * (cin + cout)            # main input + output
                        + 4 * N * nlt * 2 * halo_w * cin    # halo reads
                        + 2 * (w1t.size + w2t.size)         # bf16 weights
                        + 8 * (chid + cout)),               # folded BN params
    )

    return pl.pallas_call(
        convblock_kernel,
        out_shape=jax.ShapeDtypeStruct((N, cout, L), jnp.float32),
        grid_spec=pltpu.PrefetchScalarGridSpec(
            num_scalar_prefetch=0,
            grid=(N, nlt),
            in_specs=[
                # current tile (also residual source)
                pl.BlockSpec((1, cin, l_tile), lambda n, l: (n, 0, l)),
                # left halo: columns just left of the tile (clamped at the start)
                pl.BlockSpec((1, cin, halo_w),
                             lambda n, l: (n, 0, jnp.maximum(l * lb - 1, 0))),
                # right halo: columns just right of the tile (clamped at the end)
                pl.BlockSpec((1, cin, halo_w),
                             lambda n, l: (n, 0, jnp.minimum((l + 1) * lb, last_blk))),
                # weights / folded BN params: constant block index -> fetched once
                pl.BlockSpec((chid, KSIZE * cin), lambda n, l: (0, 0)),
                pl.BlockSpec((cout, chid), lambda n, l: (0, 0)),
                pl.BlockSpec((chid, 1), lambda n, l: (0, 0)),
                pl.BlockSpec((chid, 1), lambda n, l: (0, 0)),
                pl.BlockSpec((cout, 1), lambda n, l: (0, 0)),
                pl.BlockSpec((cout, 1), lambda n, l: (0, 0)),
            ],
            out_specs=pl.BlockSpec((1, cout, l_tile), lambda n, l: (n, 0, l)),
        ),
        compiler_params=pltpu.CompilerParams(
            dimension_semantics=("parallel", "parallel"),
            vmem_limit_bytes=vmem_limit),
        cost_estimate=cost,
    )(x_ncl, x_ncl, x_ncl, w1t, w2t, s1, b1, s2, b2)


def fold_bn(gamma, beta, mean, var, eps=1e-5):
    scale = gamma / jnp.sqrt(var + eps)
    shift = beta - mean * scale
    return scale, shift


def prepare_params(w1_oik, w2_oik, s1, b1, s2, b2):
    """PyTorch (out, in, k) conv weights -> lane-dense kernel layout (bf16 MXU)."""
    chid, cin, k = w1_oik.shape
    # (Chid, Cin, K) -> (Chid, K*Cin): column index = tap*Cin + in_channel,
    # matching the in-kernel patch row order.
    w1t = jnp.transpose(w1_oik, (0, 2, 1)).reshape(chid, k * cin).astype(jnp.bfloat16)
    w2t = w2_oik[:, :, 0].astype(jnp.bfloat16)
    return (w1t, w2t,
            s1[:, None].astype(jnp.float32), b1[:, None].astype(jnp.float32),
            s2[:, None].astype(jnp.float32), b2[:, None].astype(jnp.float32))


def convblock_forward(x_ncl, w1_oik, w2_oik, s1, b1, s2, b2, l_tile=None):
    """Full ConvBlock forward, PyTorch NCL layout in and out (no transposes)."""
    params = prepare_params(w1_oik, w2_oik, s1, b1, s2, b2)
    _, cin, L = x_ncl.shape
    chid = w1_oik.shape[0]
    cout = w2_oik.shape[0]
    vmem_limit = int(_vmem_capacity_bytes() * 0.75)   # ~25% headroom per generation
    if l_tile is None:
        l_tile = _pick_l_tile(L, cin, chid, cout, vmem_limit)
    return convblock_pallas(x_ncl, *params, l_tile=int(l_tile),
                            vmem_limit=int(vmem_limit))


def reference_convblock(x_ncl, w1_oik, w2_oik, s1, b1, s2, b2,
                        conv_dtype=jnp.float32):
    """Pure-JAX reference following PyTorch NCL / OIK conventions.

    conv_dtype=bfloat16 mirrors the kernel's bf16 MXU operands (f32 accumulation),
    so the comparison can use tight tolerances."""
    xc = x_ncl.astype(conv_dtype)
    h = lax.conv_general_dilated(
        xc, w1_oik.astype(conv_dtype), window_strides=(1,), padding=[(PAD, PAD)],
        dimension_numbers=("NCH", "OIH", "NCH"),
        preferred_element_type=jnp.float32)
    h = h * s1[None, :, None] + b1[None, :, None]
    h = h * jax.nn.sigmoid(h)
    o = lax.conv_general_dilated(
        h.astype(conv_dtype), w2_oik.astype(conv_dtype), window_strides=(1,),
        padding=[(0, 0)], dimension_numbers=("NCH", "OIH", "NCH"),
        preferred_element_type=jnp.float32)
    o = o * s2[None, :, None] + b2[None, :, None]
    return x_ncl + o


if __name__ == "__main__":
    # Small shapes consistent with ConvBlock(inp=4, oup=4, expand_ratio=2):
    #   N=2, C=4, L=16, hidden=8.  Residual requires inp == oup.
    N, C_IN, L = 2, 4, 16
    EXPAND = 2
    C_HID = round(C_IN * EXPAND)
    C_OUT = C_IN

    key = jax.random.PRNGKey(0)
    kx, kw1, kw2, kg1, kb1, km1, kv1, kg2, kb2, km2, kv2 = jax.random.split(key, 11)

    # Input in PyTorch layout (N, C, L) -- the kernel's native layout now.
    x_ncl = jax.random.normal(kx, (N, C_IN, L), jnp.float32)

    # Conv weights in PyTorch layout: (out, in, k).
    w1_oik = jax.random.normal(kw1, (C_HID, C_IN, KSIZE), jnp.float32) * 0.2
    w2_oik = jax.random.normal(kw2, (C_OUT, C_HID, 1), jnp.float32) * 0.2

    # BatchNorm parameters (inference mode, deterministic non-trivial values).
    g1 = 1.0 + 0.1 * jax.random.normal(kg1, (C_HID,), jnp.float32)
    be1 = 0.1 * jax.random.normal(kb1, (C_HID,), jnp.float32)
    m1 = 0.1 * jax.random.normal(km1, (C_HID,), jnp.float32)
    v1 = 1.0 + 0.1 * jax.random.uniform(kv1, (C_HID,), jnp.float32)
    g2 = 1.0 + 0.1 * jax.random.normal(kg2, (C_OUT,), jnp.float32)
    be2 = 0.1 * jax.random.normal(kb2, (C_OUT,), jnp.float32)
    m2 = 0.1 * jax.random.normal(km2, (C_OUT,), jnp.float32)
    v2 = 1.0 + 0.1 * jax.random.uniform(kv2, (C_OUT,), jnp.float32)
    # TODO(synk): training-mode BatchNorm (batch statistics + running-stat update)
    # is not implemented; inference-mode folded BN is used instead.

    s1, b1 = fold_bn(g1, be1, m1, v1)
    s2, b2 = fold_bn(g2, be2, m2, v2)

    # --- Test 1: module shapes (single lane-dense tile per batch element). ---
    out_ncl = convblock_forward(x_ncl, w1_oik, w2_oik, s1, b1, s2, b2)
    jax.block_until_ready(out_ncl)

    ref_bf16 = reference_convblock(x_ncl, w1_oik, w2_oik, s1, b1, s2, b2,
                                   conv_dtype=jnp.bfloat16)
    np.testing.assert_allclose(np.asarray(out_ncl), np.asarray(ref_bf16),
                               rtol=2e-3, atol=2e-3)
    # Coarse sanity check against the full-f32 module (bounds bf16 drift).
    ref_f32 = reference_convblock(x_ncl, w1_oik, w2_oik, s1, b1, s2, b2)
    np.testing.assert_allclose(np.asarray(out_ncl), np.asarray(ref_f32),
                               rtol=1e-1, atol=1e-1)

    # --- Test 2: longer sequence with a forced 128-wide L tile (4 tiles)
    #     to exercise the cross-tile halo path with lane-dense blocks. ---
    L2 = 512
    x2_ncl = jax.random.normal(jax.random.PRNGKey(1), (N, C_IN, L2), jnp.float32)
    out2 = convblock_forward(x2_ncl, w1_oik, w2_oik, s1, b1, s2, b2, l_tile=128)
    jax.block_until_ready(out2)
    ref2 = reference_convblock(x2_ncl, w1_oik, w2_oik, s1, b1, s2, b2,
                               conv_dtype=jnp.bfloat16)
    np.testing.assert_allclose(np.asarray(out2), np.asarray(ref2),
                               rtol=2e-3, atol=2e-3)

    print("KERNEL_OK")
</pallas_src>

<mosaic_0001>
module attributes {stable_mosaic.version = 11 : i64} {
  func.func @convblock_kernel(%arg0: i32, %arg1: i32, %arg2: memref<1x4x16xf32, #tpu.memory_space<vmem>>, %arg3: memref<1x4x16xf32, #tpu.memory_space<vmem>>, %arg4: memref<1x4x16xf32, #tpu.memory_space<vmem>>, %arg5: memref<8x36xbf16, #tpu.memory_space<vmem>>, %arg6: memref<4x8xbf16, #tpu.memory_space<vmem>>, %arg7: memref<8x1xf32, #tpu.memory_space<vmem>>, %arg8: memref<8x1xf32, #tpu.memory_space<vmem>>, %arg9: memref<4x1xf32, #tpu.memory_space<vmem>>, %arg10: memref<4x1xf32, #tpu.memory_space<vmem>>, %arg11: memref<1x4x16xf32, #tpu.memory_space<vmem>>) attributes {dimension_semantics = [#tpu.dimension_semantics<parallel>, #tpu.dimension_semantics<parallel>], iteration_bounds = array<i64: 2, 1>, scalar_prefetch = 0 : i64, scratch_operands = 0 : i64, tpu.core_type = #tpu.core_type<tc>, window_params = [{transform_indices = @transform_0, window_bounds = array<i64: 1, 4, 16>}, {transform_indices = @transform_1, window_bounds = array<i64: 1, 4, 16>}, {transform_indices = @transform_2, window_bounds = array<i64: 1, 4, 16>}, {pipeline_mode = #tpu.pipeline_mode<synchronous>, transform_indices = @transform_3, window_bounds = array<i64: 8, 36>}, {pipeline_mode = #tpu.pipeline_mode<synchronous>, transform_indices = @transform_4, window_bounds = array<i64: 4, 8>}, {pipeline_mode = #tpu.pipeline_mode<synchronous>, transform_indices = @transform_5, window_bounds = array<i64: 8, 1>}, {pipeline_mode = #tpu.pipeline_mode<synchronous>, transform_indices = @transform_6, window_bounds = array<i64: 8, 1>}, {pipeline_mode = #tpu.pipeline_mode<synchronous>, transform_indices = @transform_7, window_bounds = array<i64: 4, 1>}, {pipeline_mode = #tpu.pipeline_mode<synchronous>, transform_indices = @transform_8, window_bounds = array<i64: 4, 1>}, {transform_indices = @transform_9, window_bounds = array<i64: 1, 4, 16>}]} {
    %c0 = arith.constant 0 : index
    %c0_0 = arith.constant 0 : index
    %c0_1 = arith.constant 0 : index
    %0 = vector.load %arg2[%c0, %c0_0, %c0_1] : memref<1x4x16xf32, #tpu.memory_space<vmem>>, vector<1x4x16xf32>
    %1 = vector.shape_cast %0 : vector<1x4x16xf32> to vector<4x16xf32>
    %c0_2 = arith.constant 0 : index
    %c0_3 = arith.constant 0 : index
    %c0_4 = arith.constant 0 : index
    %2 = vector.load %arg3[%c0_2, %c0_3, %c0_4] : memref<1x4x16xf32, #tpu.memory_space<vmem>>, vector<1x4x16xf32>
    %3 = vector.shape_cast %2 : vector<1x4x16xf32> to vector<4x16xf32>
    %4 = vector.extract_strided_slice %3 {offsets = [0, 12], sizes = [4, 4], strides = [1, 1]} : vector<4x16xf32> to vector<4x4xf32>
    %c0_5 = arith.constant 0 : index
    %c0_6 = arith.constant 0 : index
    %c0_7 = arith.constant 0 : index
    %5 = vector.load %arg4[%c0_5, %c0_6, %c0_7] : memref<1x4x16xf32, #tpu.memory_space<vmem>>, vector<1x4x16xf32>
    %6 = vector.shape_cast %5 : vector<1x4x16xf32> to vector<4x16xf32>
    %7 = vector.extract_strided_slice %6 {offsets = [0, 0], sizes = [4, 4], strides = [1, 1]} : vector<4x16xf32> to vector<4x4xf32>
    %c0_i32 = arith.constant 0 : i32
    %8 = arith.cmpi sgt, %arg1, %c0_i32 : i32
    %cst = arith.constant 0.000000e+00 : f32
    %9 = vector.broadcast %cst : f32 to vector<4x4xf32>
    %10 = arith.select %8, %4, %9 : vector<4x4xf32>
    %c0_i32_8 = arith.constant 0 : i32
    %11 = arith.cmpi slt, %arg1, %c0_i32_8 : i32
    %cst_9 = arith.constant 0.000000e+00 : f32
    %12 = vector.broadcast %cst_9 : f32 to vector<4x4xf32>
    %13 = arith.select %11, %7, %12 : vector<4x4xf32>
    %14 = tpu.concatenate %10, %1, %13 in 1 : vector<4x4xf32>, vector<4x16xf32>, vector<4x4xf32> -> vector<4x24xf32>
    %15 = arith.truncf %14 : vector<4x24xf32> to vector<4x24xbf16>
    %16 = vector.extract_strided_slice %15 {offsets = [0, 0], sizes = [4, 16], strides = [1, 1]} : vector<4x24xbf16> to vector<4x16xbf16>
    %17 = vector.extract_strided_slice %15 {offsets = [0, 1], sizes = [4, 16], strides = [1, 1]} : vector<4x24xbf16> to vector<4x16xbf16>
    %18 = vector.extract_strided_slice %15 {offsets = [0, 2], sizes = [4, 16], strides = [1, 1]} : vector<4x24xbf16> to vector<4x16xbf16>
    %19 = vector.extract_strided_slice %15 {offsets = [0, 3], sizes = [4, 16], strides = [1, 1]} : vector<4x24xbf16> to vector<4x16xbf16>
    %20 = vector.extract_strided_slice %15 {offsets = [0, 4], sizes = [4, 16], strides = [1, 1]} : vector<4x24xbf16> to vector<4x16xbf16>
    %21 = vector.extract_strided_slice %15 {offsets = [0, 5], sizes = [4, 16], strides = [1, 1]} : vector<4x24xbf16> to vector<4x16xbf16>
    %22 = vector.extract_strided_slice %15 {offsets = [0, 6], sizes = [4, 16], strides = [1, 1]} : vector<4x24xbf16> to vector<4x16xbf16>
    %23 = vector.extract_strided_slice %15 {offsets = [0, 7], sizes = [4, 16], strides = [1, 1]} : vector<4x24xbf16> to vector<4x16xbf16>
    %24 = vector.extract_strided_slice %15 {offsets = [0, 8], sizes = [4, 16], strides = [1, 1]} : vector<4x24xbf16> to vector<4x16xbf16>
    %25 = tpu.concatenate %16, %17, %18, %19, %20, %21, %22, %23, %24 in 0 : vector<4x16xbf16>, vector<4x16xbf16>, vector<4x16xbf16>, vector<4x16xbf16>, vector<4x16xbf16>, vector<4x16xbf16>, vector<4x16xbf16>, vector<4x16xbf16>, vector<4x16xbf16> -> vector<36x16xbf16>
    %c0_10 = arith.constant 0 : index
    %c0_11 = arith.constant 0 : index
    %26 = vector.load %arg5[%c0_10, %c0_11] : memref<8x36xbf16, #tpu.memory_space<vmem>>, vector<8x36xbf16>
    %cst_12 = arith.constant dense<0.000000e+00> : vector<8x16xf32>
    %27 = tpu.matmul %26, %25, %cst_12 {dimension_numbers = #tpu.dot_dimension_numbers<[1], [0], [0], [1], [0, 0, 1, 1], [], []>} : vector<8x36xbf16>, vector<36x16xbf16>, vector<8x16xf32> -> vector<8x16xf32>
    %c0_13 = arith.constant 0 : index
    %c0_14 = arith.constant 0 : index
    %28 = vector.load %arg7[%c0_13, %c0_14] : memref<8x1xf32, #tpu.memory_space<vmem>>, vector<8x1xf32>
    %29 = vector.broadcast %28 : vector<8x1xf32> to vector<8x16xf32>
    %30 = arith.mulf %27, %29 : vector<8x16xf32>
    %c0_15 = arith.constant 0 : index
    %c0_16 = arith.constant 0 : index
    %31 = vector.load %arg8[%c0_15, %c0_16] : memref<8x1xf32, #tpu.memory_space<vmem>>, vector<8x1xf32>
    %32 = vector.broadcast %31 : vector<8x1xf32> to vector<8x16xf32>
    %33 = arith.addf %30, %32 : vector<8x16xf32>
    %34 = arith.negf %33 : vector<8x16xf32>
    %35 = math.exp %34 : vector<8x16xf32>
    %cst_17 = arith.constant 1.000000e+00 : f32
    %36 = vector.broadcast %cst_17 : f32 to vector<8x16xf32>
    %37 = arith.addf %36, %35 : vector<8x16xf32>
    %38 = arith.divf %36, %37 : vector<8x16xf32>
    %39 = arith.mulf %33, %38 : vector<8x16xf32>
    %c0_18 = arith.constant 0 : index
    %c0_19 = arith.constant 0 : index
    %40 = vector.load %arg6[%c0_18, %c0_19] : memref<4x8xbf16, #tpu.memory_space<vmem>>, vector<4x8xbf16>
    %41 = arith.truncf %39 : vector<8x16xf32> to vector<8x16xbf16>
    %cst_20 = arith.constant dense<0.000000e+00> : vector<4x16xf32>
    %42 = tpu.matmul %40, %41, %cst_20 {dimension_numbers = #tpu.dot_dimension_numbers<[1], [0], [0], [1], [0, 0, 1, 1], [], []>} : vector<4x8xbf16>, vector<8x16xbf16>, vector<4x16xf32> -> vector<4x16xf32>
    %c0_21 = arith.constant 0 : index
    %c0_22 = arith.constant 0 : index
    %43 = vector.load %arg9[%c0_21, %c0_22] : memref<4x1xf32, #tpu.memory_space<vmem>>, vector<4x1xf32>
    %44 = vector.broadcast %43 : vector<4x1xf32> to vector<4x16xf32>
    %45 = arith.mulf %42, %44 : vector<4x16xf32>
    %c0_23 = arith.constant 0 : index
    %c0_24 = arith.constant 0 : index
    %46 = vector.load %arg10[%c0_23, %c0_24] : memref<4x1xf32, #tpu.memory_space<vmem>>, vector<4x1xf32>
    %47 = vector.broadcast %46 : vector<4x1xf32> to vector<4x16xf32>
    %48 = arith.addf %45, %47 : vector<4x16xf32>
    %49 = arith.addf %1, %48 : vector<4x16xf32>
    %c0_25 = arith.constant 0 : index
    %c0_26 = arith.constant 0 : index
    %c0_27 = arith.constant 0 : index
    %50 = vector.load %arg11[%c0_25, %c0_26, %c0_27] : memref<1x4x16xf32, #tpu.memory_space<vmem>>, vector<1x4x16xf32>
    %51 = vector.shape_cast %50 : vector<1x4x16xf32> to vector<4x16xf32>
    %52 = vector.shape_cast %49 : vector<4x16xf32> to vector<1x4x16xf32>
    tpu.vector_store %arg11[%c0_25, %c0_26, %c0_27], %52 {strides = array<i32>} : memref<1x4x16xf32, #tpu.memory_space<vmem>>, vector<1x4x16xf32>,
    return
  }
  func.func @transform_0(%arg0: i32, %arg1: i32) -> (i32, i32, i32) {
    %c0_i32 = arith.constant 0 : i32
    %c0_i32_0 = arith.constant 0 : i32
    return %arg0, %c0_i32, %arg1 : i32, i32, i32
  }
  func.func @transform_1(%arg0: i32, %arg1: i32) -> (i32, i32, i32) {
    %c1_i32 = arith.constant 1 : i32
    %0 = arith.muli %arg1, %c1_i32 : i32
    %c1_i32_0 = arith.constant 1 : i32
    %1 = arith.subi %0, %c1_i32_0 : i32
    %c0_i32 = arith.constant 0 : i32
    %2 = arith.maxsi %1, %c0_i32 : i32
    %c0_i32_1 = arith.constant 0 : i32
    %c0_i32_2 = arith.constant 0 : i32
    return %arg0, %c0_i32_1, %2 : i32, i32, i32
  }
  func.func @transform_2(%arg0: i32, %arg1: i32) -> (i32, i32, i32) {
    %c1_i32 = arith.constant 1 : i32
    %0 = arith.addi %arg1, %c1_i32 : i32
    %c1_i32_0 = arith.constant 1 : i32
    %1 = arith.muli %0, %c1_i32_0 : i32
    %c0_i32 = arith.constant 0 : i32
    %2 = arith.minsi %1, %c0_i32 : i32
    %c0_i32_1 = arith.constant 0 : i32
    %c0_i32_2 = arith.constant 0 : i32
    return %arg0, %c0_i32_1, %2 : i32, i32, i32
  }
  func.func @transform_3(%arg0: i32, %arg1: i32) -> (i32, i32) {
    %c0_i32 = arith.constant 0 : i32
    %c0_i32_0 = arith.constant 0 : i32
    %c0_i32_1 = arith.constant 0 : i32
    return %c0_i32, %c0_i32_0 : i32, i32
  }
  func.func @transform_4(%arg0: i32, %arg1: i32) -> (i32, i32) {
    %c0_i32 = arith.constant 0 : i32
    %c0_i32_0 = arith.constant 0 : i32
    %c0_i32_1 = arith.constant 0 : i32
    return %c0_i32, %c0_i32_0 : i32, i32
  }
  func.func @transform_5(%arg0: i32, %arg1: i32) -> (i32, i32) {
    %c0_i32 = arith.constant 0 : i32
    %c0_i32_0 = arith.constant 0 : i32
    %c0_i32_1 = arith.constant 0 : i32
    return %c0_i32, %c0_i32_0 : i32, i32
  }
  func.func @transform_6(%arg0: i32, %arg1: i32) -> (i32, i32) {
    %c0_i32 = arith.constant 0 : i32
    %c0_i32_0 = arith.constant 0 : i32
    %c0_i32_1 = arith.constant 0 : i32
    return %c0_i32, %c0_i32_0 : i32, i32
  }
  func.func @transform_7(%arg0: i32, %arg1: i32) -> (i32, i32) {
    %c0_i32 = arith.constant 0 : i32
    %c0_i32_0 = arith.constant 0 : i32
    %c0_i32_1 = arith.constant 0 : i32
    return %c0_i32, %c0_i32_0 : i32, i32
  }
  func.func @transform_8(%arg0: i32, %arg1: i32) -> (i32, i32) {
    %c0_i32 = arith.constant 0 : i32
    %c0_i32_0 = arith.constant 0 : i32
    %c0_i32_1 = arith.constant 0 : i32
    return %c0_i32, %c0_i32_0 : i32, i32
  }
  func.func @transform_9(%arg0: i32, %arg1: i32) -> (i32, i32, i32) {
    %c0_i32 = arith.constant 0 : i32
    %c0_i32_0 = arith.constant 0 : i32
    return %arg0, %c0_i32, %arg1 : i32, i32, i32
  }
}

</mosaic_0001>

<bundles_post_ra>
// kernel: convblock_pallas.1
= control target key start
LH: loop header
LB: loop body
LE: loop exit
PB: predicated region body
PF: predicated region fallthrough
CT: control target
= control target key end

     0   :  { %14 = vsyncpa [#allocation3], 0  ;;  %s1169_s0 = inlined_call_operand.vmem [shape: f32[2,4,16], index: 0, kind: input, shape index: {}, may-alias: {0,1,2}]   ;;  %s1170_s1 = inlined_call_operand.vmem [shape: f32[2,4,16], index: 1, kind: input, shape index: {}, may-alias: {0,1,2}]   ;;  %s1171_s2 = inlined_call_operand.vmem [shape: f32[2,4,16], index: 2, kind: input, shape index: {}, may-alias: {0,1,2}]   ;;  %s1172_s3 = inlined_call_operand.vmem [shape: bf16[8,36], index: 3, kind: input, shape index: {}]   ;;  %s1173_s4 = inlined_call_operand.vmem [shape: bf16[4,8], index: 4, kind: input, shape index: {}]   ;;  %s1174_s5 = inlined_call_operand.vmem [shape: f32[8,1], index: 5, kind: input, shape index: {}]   ;;  %s1175_s6 = inlined_call_operand.vmem [shape: f32[8,1], index: 6, kind: input, shape index: {}]   ;;  %s1176_s7 = inlined_call_operand.vmem [shape: f32[4,1], index: 7, kind: input, shape index: {}]   ;;  %s1177_s8 = inlined_call_operand.vmem [shape: f32[4,1], index: 8, kind: input, shape index: {}]   ;;  %s1178_s9 = inlined_call_operand.hbm [shape: f32[2,4,16], index: 9, kind: output, shape index: {}]  }
   0x1   :  { %16 = vsyncpa [#allocation3 + $0x1], 0  ;;  %s1028_s28 = smov 0   ;;  %s1030_s29 = smov 0  }
   0x2   :  { %s1032_s30 = smov 0   ;;  %s1034_s10 = smov 0  }
   0x3   :  { %s1036_s11 = smov 0   ;;  %s1038_s12 = smov 0  }
   0x4 LB: > { %s772_s13 = sadd.s32 4294967295, %s961_s12   ;;  %s773_s14 = sadd.s32 4294967294, %s961_s12   ;;  %s961_s12 = sphi %s1038_s12, %s22_s12   ;;  %s957_s11 = sphi %s1036_s11, %s1185_s11   ;;  %s953_s10 = sphi %s1034_s10, %s1184_s10   ;;  %s949_s30 = sphi %s1032_s30, %s1183_s30   ;;  %s945_s29 = sphi %s1030_s29, %s1182_s29   ;;  %s941_s28 = sphi %s1028_s28, %s1181_s28  }
   0x5   : > { %s34_s15 = sadd.s32 1, %s957_s11  ;;  %s265_s16 = sadd.s32 1, %s949_s30 }
   0x6   : > { %p36_p0 = scmp.ge.s32.totalorder %s34_s15, 2  ;;  %p275_p1 = scmp.ne.s32.totalorder %s949_s30, %s945_s29 }
   0x7   : > { %p276_p2 = scmp.eq.s32.totalorder %s772_s13, 1  ;;  %p281_p3 = scmp.ne.s32.totalorder %s945_s29, %s941_s28 }
   0x8   : > { %s1187_s15 = smov (%p36_p0, %s34_s15), 0  ;;  %p282_p5 = scmp.eq.s32.totalorder %s773_s14, 1 }
   0x9   : > { %p1068_p4 = por %p276_p2, %p275_p1  ;;  %s260_s18 = ssub.s32 %s957_s11, %s1187_s15 }
   0xa   : > { %p776_p6 = scmp.ge.s32.totalorder %s961_s12, 1  ;;  %p263_p7 = scmp.eq.s32.totalorder %s260_s18, 0 }
   0xb   : > { %p1075_p8 = por %p282_p5, %p281_p3  ;;  %p360_p9 = scmp.lt.s32.totalorder %s961_s12, 3 }
   0xc   : > { %s1081_s20 = scalar_select %p263_p7, %s949_s30, %s265_s16  }
   0xd   : > { %p361_p10 = pnand %p776_p6, %p360_p9 }
   0xe   : > { %p418_p11 = scmp.lt.s32.totalorder (!%p361_p10), %s953_s10, 1  ;;  %s964_s21 = smov (!%p361_p10), 116  }
   0xf   : > { %364 = sbr.rel (%p361_p10) target bundleno = 725 (0x2d5), region = 56  ;;  %s965_s23 = smov (!%p361_p10), 20  }
  0x10   : > { %s966_s27 = smov (!%p361_p10), 4   ;;  %s967_s2 = smov (!%p361_p10), 124  }
  0x11   : > { %s968_s13 = smov (!%p361_p10), 120   ;;  %s970_s14 = smov (!%p361_p10), 122  }
  0x12   : > { %s971_s16 = smov (!%p361_p10), 123   ;;  %s973_s18 = smov (!%p361_p10), 127  }
  0x13   : > { %s785_s25 = sshll.u32 (!%p361_p10), %s953_s10, 6 }
  0x14   : > { %v963_v0 = vmov 0.0   ;;  %s419_s22 = scalar_select %p418_p11, %s953_s10, 1  ;;  %vm477_vm0 = vcmask 31744   ;;  %vm479_vm1 = vcmask 162816   ;;  %vm969_vm2 = vmmov 0   ;;  %v569_v12 = vld [vmem:[%s1174_s5] sm:$0xff] }
  0x15   : > { %466 = vrot.lane.b32.xlu0 %v963_v0, %s964_s21  ;;  %794 = vmatprep.subr.bf16.mxu0 %v963_v0  ;;  %v972_v10 = vmov 0   ;;  %s974_s21 = smov 121   ;;  %v576_v13 = vld [vmem:[%s1175_s6] sm:$0xff]  ;;  %vm502_vm3 = vcmask 1041408   ;;  %vm506_vm4 = vcmask 1043456   ;;  %vm509_vm5 = vcmask 1045504  }
  0x16   : > { %474 = vrot.lane.b32.xlu1 %v963_v0, %s965_s23  ;;  %804 = vmatprep.subr.bf16.mxu1 %v963_v0  ;;  %s778_s24 = sshll.u32 %s419_s22, 2  ;;  %s975_s22 = smov 125   ;;  %v639_v14 = vld [vmem:[%s1176_s7] sm:$0xf]  ;;  %vm522_vm6 = vcmask 293888   ;;  %vm592_vm7 = vcmask 64512  }
  0x17   : > { %s424_s1 = scalar_lea.vmem %s1169_s0, %s778_s24  ;;  %800 = vmatprep.mubr.msk.bf16.mxu0 %vm969_vm2, %v963_v0  ;;  %806 = vmatprep.mubr.msk.bf16.mxu1 %vm969_vm2, %v963_v0  ;;  %s976_s23 = smov 126   ;;  %v646_v15 = vld [vmem:[%s1177_s8] sm:$0xf]  ;;  %vm654_vm8 = vcmask 125952  }
  0x18   : > { %v1092_v1 = vld [vmem:[%s424_s1] sm:$0xf]  ;;  %879 = vset.pattern.permute.xlu1 %v972_v10  ;;  %880 = vset.pattern.permute.xlu0 %v972_v10  ;;  %s977_s10 = smov [#allocation2]  }
  0x19   : > { %470 = vrot.lane.b32.xlu0 %v1092_v1, %s966_s27  ;;  %v521_v31 = vld [vmem:[%s1172_s3] sm:$0xf] }
  0x1a   : > { %v590_v47 = vld [vmem:[%s1173_s4] sm:$0x3] }
  0x87   : > { %v467_v2 = vpop.permute.xlu0 %466 }
  0x88   : > { %v475_v3 = vpop.permute.xlu1 %474 }
  0x8b   : > { %v471_v4 = vpop.permute.xlu0 %470 }
  0x8c   : > { %v478_v5 = vsel %vm477_vm0, %v467_v2, %v471_v4 }
  0x8d   : > { %v480_v6 = vsel %vm479_vm1, %v478_v5, %v475_v3 }
  0x8e   : > { %v481_v7 = vpack.c.bf16 %v480_v6, %v480_v6 }
  0x90   : > { %492 = vrot.lane.b32.xlu0 %v481_v7, %s967_s2  ;;  %500 = vrot.lane.b32.xlu1 %v481_v7, %s968_s13  ;;  %v486_v8 = vrot.slane %v481_v7, 4  ;;  %v483_v9 = vrot.slane %v481_v7, 6  ;;  %v489_v11 = vrot.slane %v481_v7, 2  ;;  %s1129_s13 = scalar_lea.hbm %s1178_s9, %s785_s25 }
  0x94   : > { %496 = vrot.lane.b32.xlu0 %v486_v8, %s970_s14  ;;  %494 = vrot.lane.b32.xlu1 %v483_v9, %s971_s16 }
  0x98   : > { %484 = vrot.lane.b32.xlu0 %v483_v9, %s973_s18  ;;  %498 = vrot.lane.b32.xlu1 %v489_v11, %s974_s21  ;;  %s889_s18 = sshll.u32 %s977_s10, 4  ;;  %s890_s18 = int_to_ptr.vmem [resolvable:$false] %s889_s18 }
  0x99   : > { %s891_s21 = scalar_lea.vmem %s890_s18, 128 }
  0x9c   : > { %490 = vrot.lane.b32.xlu0 %v489_v11, %s975_s22  ;;  %487 = vrot.lane.b32.xlu1 %v486_v8, %s976_s23  ;;  %s415_s23 = sand.u32 1, %s945_s29  }
  0x9d   : > { %s777_s24 = sshll.u32 %s415_s23, 2  ;;  %s657_s14 = scalar_lea.sflag [#allocation3], %s415_s23 }
  0x9e   : > { %s417_s26 = scalar_lea.vmem [#allocation2], %s777_s24 }
  0x9f   : > { %s671_s1 = sshll.u32 %s417_s26, 4  ;;  %s672_s1 = int_to_ptr.vmem [resolvable:$true] %s671_s1 }
  0xa0   : > { %572 = vperm.xlu1 %879, %v569_v12   ;;  %579 = vperm.xlu0 %880, %v576_v13   ;;  %s885_s16 = scalar_lea.vmem %s672_s1, 64  ;;  %p892_p1 = scmp.lt.s32.totalorder %s672_s1, %s890_s18 }
  0xa1   : > { %p886_p12 = scmp.ne.s32.totalorder %s672_s1, %s885_s16  ;;  %p893_p2 = scmp.lt.s32.totalorder %s891_s21, %s885_s16 }
  0xa3   : > { %p887_p13 = pnand %p886_p12, %p1068_p4  ;;  %p894_p3 = por %p893_p2, %p892_p1 }
  0xa4   : > { %642 = vperm.xlu1 %879, %v639_v14  }
  0xa5   : > { %p888_p0 = pneg %p887_p13 }
  0xa7   : > { %p895_p5 = pnand %p894_p3, %p888_p0 }
  0xa8   : > { %649 = vperm.xlu1 %879, %v646_v15  }
 0x102   : > { %v493_v16 = vpop.permute.xlu0 %492  ;;  %v501_v17 = vpop.permute.xlu1 %500 }
 0x103   : > { %v527_v18 = vsel %vm502_vm3, %v501_v17, 0 }
 0x104   : > { %795 = vmatpush3.bf16.msra.mxu0 %v527_v18 }
 0x105   : > { %796 = vmatprep.subr.bf16.mxu0 %v963_v0 }
 0x106   : > { %v497_v19 = vpop.permute.xlu0 %496  ;;  %v495_v20 = vpop.permute.xlu1 %494 }
 0x107   : > { %v515_v21 = vsel %vm502_vm3, %v493_v16, %v495_v20 }
 0x108   : > { %v517_v24 = vsel %vm506_vm4, %v515_v21, %v497_v19 }
 0x10a   : > { %v485_v22 = vpop.permute.xlu0 %484  ;;  %v499_v23 = vpop.permute.xlu1 %498 }
 0x10b   : > { %v519_v25 = vsel %vm509_vm5, %v517_v24, %v499_v23  ;;  %v505_v26 = vsel %vm502_vm3, %v481_v7, %v485_v22 }
 0x10c   : > { %797 = vmatpush3.bf16.msra.mxu0 %v519_v25 }
 0x10d   : > { %798 = vmatprep.subr.bf16.mxu0 %v963_v0 }
 0x10e   : > { %v491_v27 = vpop.permute.xlu0 %490  ;;  %v488_v28 = vpop.permute.xlu1 %487 }
 0x10f   : > { %v508_v29 = vsel %vm506_vm4, %v505_v26, %v488_v28 }
 0x110   : > { %v511_v30 = vsel %vm509_vm5, %v508_v29, %v491_v27 }
 0x111   : > { %799 = vmatpush3.bf16.msra.mxu0 %v511_v30 }
 0x114   : > { %801 = vmatmul.mubr.msk.bf16.vlgmr.msra.gmra.mxu0 %vm522_vm6, %v521_v31 }
 0x11b   : > { %v573_v32 = vpop.permute.xlu1 %572  ;;  %v580_v34 = vpop.permute.xlu0 %579 }
 0x11f   : > { %v643_v48 = vpop.permute.xlu1 %642 }
 0x123   : > { %v650_v51 = vpop.permute.xlu1 %649 }
 0x1d4   : > { %v563_v33 = vpop.f32.mrf.mxu0 }
 0x1d5   : > { %v575_v35 = vmul.f32 %v573_v32, %v563_v33 }
 0x1d6   : > { %v802_v36 = vpop.f32.mrf.mxu0 }
 0x1d7   : > { %v582_v37 = vadd.f32 %v580_v34, %v575_v35 }
 0x1d8   : > { %v566_v38 = vpop.f32.mrf.mxu0 }
 0x1d9   : > { %v782_v39 = vmul.f32 -1.442695, %v582_v37 }
 0x1da   : > { %v803_v40 = vpop.f32.mrf.mxu0 }
 0x1db   : > { %881 = vpow2.f32 %v782_v39 }
 0x1e8   : > { %v882_v41 = vpop.eup %881 }
 0x1e9   : > { %v586_v42 = vadd.f32 1.0, %v882_v41 }
 0x1eb   : > { %883 = vrcp.f32 %v586_v42 }
 0x1f8   : > { %v884_v43 = vpop.eup %883 }
 0x1f9   : > { %v589_v44 = vmul.f32 %v884_v43, %v582_v37 }
 0x1fb   : > { %v591_v45 = vpack.c.bf16 %v589_v44, %v589_v44 }
 0x1fd   : > { %v597_v46 = vsel %vm506_vm4, %v591_v45, 0 }
 0x1fe   : > { %805 = vmatpush3.bf16.msra.mxu1 %v597_v46 }
 0x201   : > { %807 = vmatmul.mubr.msk.bf16.vlgmr.msra.gmra.mxu1 %vm592_vm7, %v590_v47 }
 0x2c1   : > { %v633_v49 = vpop.f32.mrf.mxu1 }
 0x2c2   : > { %v645_v50 = vmul.f32 %v643_v48, %v633_v49 }
 0x2c3   : > { %v808_v52 = vpop.f32.mrf.mxu1 }
 0x2c4   : > { %v652_v53 = vadd.f32 %v650_v51, %v645_v50 }
 0x2c5   : > { %v636_v54 = vpop.f32.mrf.mxu1 }
 0x2c6   : > { %v653_v55 = vadd.f32 %v652_v53, %v1092_v1 }
 0x2c7   : > { %v809_v56 = vpop.f32.mrf.mxu1 }
 0x2c8   : > { %655 = vst.msk [vmem:[%s417_s26] sm:$0xf] %vm654_vm8, %v653_v55 }
 0x2c9   : > { %898 = shalt.err (!%p895_p5)
}
 0x2ca   : > { %s899_s22 = scalar_lea.hbm %s1129_s13, 64  ;;  %s903_s25 = scalar_lea.hbm %s1178_s9, 128 }
 0x2cb   : > { %p900_p6 = scmp.ne.s32.totalorder %s1129_s13, %s899_s22  ;;  %p904_p10 = scmp.lt.s32.totalorder %s1129_s13, %s1178_s9 }
 0x2cc   : > { %p905_p11 = scmp.lt.s32.totalorder %s903_s25, %s899_s22 }
 0x2cd   : > { %p901_p7 = pnand %p900_p6, %p1068_p4 }
 0x2ce   : > { %p906_p12 = por %p905_p11, %p904_p10 }
 0x2cf   : > { %p902_p9 = pneg %p901_p7 }
 0x2d1   : > { %p907_p13 = pnand %p906_p12, %p902_p9 }
 0x2d3   : > { %910 = shalt.err (!%p907_p13)
}
 0x2d4   : > { %810 = dma.vmem_to_hbm [thread:$0]  (%p1068_p4), %s672_s1, 64, %s1129_s13, %s657_s14  }
 0x2d5 PF: > { %p816_p0 = scmp.ge.s32.totalorder %s961_s12, 2  ;;  %s683_s2 = sand.u32 1, %s941_s28  }
 0x2d6   : > { %s684_s16 = scalar_lea.sflag [#allocation3], %s683_s2 }
 0x2d7   : > { %p813_p1 = pnand %p816_p0, %p1075_p8 }
 0x2d9   : > { %p814_p2 = pneg %p813_p1 }
 0x2db   : > { %936 = dma.done.wait (%p814_p2), %s684_s16, 64  }
 0x2dc   : > { %938 = vsyncadd (%p814_p2), %s684_s16, 4294967232  ;;  %s22_s12 = sadd.s32 1, %s961_s12   ;;  %s1181_s28 = smov %s945_s29 }
 0x2dd   : > { %p19_p3 = scmp.ge.s32.totalorder %s22_s12, 4   ;;  %s1182_s29 = smov %s949_s30 }
 0x2de   : > { %s1183_s30 = smov %s1081_s20  ;;  %s1184_s10 = smov %s957_s11 }
 0x2df   : > { %s1185_s11 = smov %s1187_s15  ;;  %21 = sbr.rel (!%p19_p3) target bundleno = 4 (0x4), region = 97 }
 0x2e4   :  { %689 = vsyncpa [#allocation3], 1 }
 0x2e5   :  { %691 = vsyncpa [#allocation3 + $0x1], 1 }

</bundles_post_ra>
